<compile_context>
chip_gen: v7x
topology: tpu7x:2x2x1
jax: 0.10.0
libtpu: 0.0.40
codegen_flags: <defaults>
</compile_context>

<pallas_src>
import jax
import jax.numpy as jnp
import numpy as np
from jax.experimental import pallas as pl
from jax.experimental.pallas import tpu as pltpu


# ------------------------------ configuration ------------------------------- #
def _choose_group(width, cin):
    """Input pixels packed per matmul row: smallest power-of-2 divisor of
    `width` giving K = g*cin of ~128 lanes (review: target 128, not 256), while
    keeping >= 8 matmul rows per image row and bounding the kron expansion."""
    g = 1
    while (g * cin < 128 and g < 32
           and width % (2 * g) == 0
           and width // (2 * g) >= 8):
        g *= 2
    return g


def _vmem_limit_bytes(per_step_bytes):
    """Generation-aware scoped-VMEM request (review item)."""
    cap = 64 * 1024 * 1024                       # conservative default (v7x/TC)
    try:
        cap = int(pltpu.get_tpu_info().vmem_capacity_bytes)
    except Exception:
        pass
    hard_cap = max(int(cap * 3 // 4), 32 * 1024 * 1024)   # ~48 MiB v7x, ~96 MiB v5e/v6e
    return min(max(32 * 1024 * 1024, 2 * per_step_bytes), hard_cap)


# ------------------------- one-time weight preparation ----------------------- #
def init_upsample_block(key, in_channels, channels):
    """Synthetic weights matching ConvTranspose2d(last, ch, 2, 2, 0, bias=False)."""
    weights = []
    last = in_channels
    for ch in channels:
        key, sub = jax.random.split(key)
        fan = last * 2 * 2
        w = jax.random.normal(sub, (last, ch, 2, 2), dtype=jnp.float32) / np.sqrt(fan)
        weights.append(w)
        last = ch
    return weights


def pack_upsample_weights(weights, in_width, in_channels, dtype=jnp.bfloat16):
    """Hoisted out of the forward (review item). For every layer returns
    (w_top, w_bot): block-diagonal expansions of the (Cin_l, 2*Cout_l) per-pixel
    matrices for output sub-row di=0 / di=1 with column order (dj, co).
    Chained, layer l's output columns are (p_w, d1j, ..., dlj, co) == raster
    order along the output width."""
    g = _choose_group(in_width, in_channels)
    packed = []
    groups = g                     # pixel groups per matmul row at this layer
    c_prev = in_channels
    for w in weights:                                  # (c_prev, c_out, 2, 2)
        c_out = w.shape[1]
        eye = jnp.eye(groups, dtype=jnp.float32)

        def expand(w_di):                              # (c_prev, c_out, 2[dj])
            m = jnp.transpose(w_di, (0, 2, 1)).reshape(c_prev, 2 * c_out)
            return jnp.kron(eye, m).astype(dtype)      # (G*Cin, G*2*Cout)

        packed.append((expand(w[:, :, 0, :]), expand(w[:, :, 1, :])))
        groups *= 2
        c_prev = c_out
    return packed


# --------------------------------- kernel ------------------------------------ #
def _make_fused_kernel(num_layers):
    def kernel(x_ref, *rest):
        # x_ref: (1, W/g, g*Cin); rest = (w_top_1, w_bot_1, ..., o_ref)
        o_ref = rest[-1]                    # (1, 2^L, W/g, g*2^L*C_last)
        w_refs = rest[:-1]
        bufs = [x_ref[0]]                   # list index == vertical sub-row r
        for l in range(num_layers):
            w_top = w_refs[2 * l][...]
            w_bot = w_refs[2 * l + 1][...]
            nxt = []
            for buf in bufs:
                top = jnp.dot(buf, w_top, preferred_element_type=jnp.float32)
                bot = jnp.dot(buf, w_bot, preferred_element_type=jnp.float32)
                nxt.append(jnp.maximum(top, 0.0).astype(o_ref.dtype))
                nxt.append(jnp.maximum(bot, 0.0).astype(o_ref.dtype))
            bufs = nxt
        for r, buf in enumerate(bufs):      # raster store, no de-interleave
            o_ref[0, r] = buf
    return kernel


# -------------------------------- forward ------------------------------------ #
@jax.jit
def upsample_block_forward(x, packed):
    """x: (B, Cin, H, W) NCHW.  packed: output of pack_upsample_weights."""
    B, Cin, H, W = x.shape
    L = len(packed)
    dtype = packed[0][0].dtype

    g = packed[0][0].shape[0] // Cin
    rows = W // g                               # matmul rows per image row
    n_last = packed[-1][0].shape[1]             # g * 2^L * C_last
    c_last = n_last // (g * (2 ** L))

    # entry: NCHW -> (B*H, W/g, g*Cin) pixel stream (smallest tensor, one cheap
    # XLA transpose); activations carried in bf16 from here on.
    x3 = jnp.transpose(x, (0, 2, 3, 1)).astype(dtype).reshape(B * H, rows, g * Cin)

    w_args = [w for pair in packed for w in pair]

    in_specs = [pl.BlockSpec((1, rows, g * Cin), lambda k: (k, 0, 0))]
    for w in w_args:                            # weights fully resident in VMEM
        in_specs.append(pl.BlockSpec(w.shape, lambda k: (0, 0)))
    out_specs = pl.BlockSpec((1, 2 ** L, rows, n_last), lambda k: (k, 0, 0, 0))

    # VMEM budget: double-buffered IO blocks + resident weights + f32 dot temps
    # (review item: count the accumulator-sized temporaries).
    itemsize = jnp.dtype(dtype).itemsize
    io_bytes = (rows * g * Cin + (2 ** L) * rows * n_last) * itemsize
    w_bytes = sum(int(np.prod(w.shape)) * itemsize for w in w_args)
    acc_bytes = sum((2 ** (l + 1)) * rows * packed[l][0].shape[1] * 4
                    for l in range(L))
    per_step = 2 * (io_bytes + w_bytes) + acc_bytes

    out = pl.pallas_call(
        _make_fused_kernel(L),
        out_shape=jax.ShapeDtypeStruct((B * H, 2 ** L, rows, n_last), dtype),
        grid_spec=pltpu.PrefetchScalarGridSpec(
            num_scalar_prefetch=0,
            grid=(B * H,),                      # >= 2 -> megacore row sharding
            in_specs=in_specs,
            out_specs=out_specs,
        ),
        compiler_params=pltpu.CompilerParams(
            dimension_semantics=("parallel",),
            vmem_limit_bytes=_vmem_limit_bytes(per_step),
        ),
    )(x3, *w_args)

    # `out` is already the output in raster NHWC order: free reshape.
    y_nhwc = out.reshape(B, H * (2 ** L), W * (2 ** L), c_last)
    # TODO(synk): this NHWC->NCHW permute is the only remaining full pass over
    # the largest tensor; it exists solely to honor the PyTorch NCHW output
    # contract — drop it if the consumer accepts channels-last.
    return jnp.transpose(y_nhwc, (0, 3, 1, 2))


# ------------------------------ reference (JAX) ------------------------------ #
def _ref_forward(x, weights):
    """Pure-XLA reference using lhs-dilated convolution (== ConvTranspose2d)."""
    out = x
    for w in weights:
        w_conv = jnp.flip(w, axis=(2, 3)).transpose(1, 0, 2, 3)   # (Cout, Cin, 2, 2)
        out = jax.lax.conv_general_dilated(
            out, w_conv,
            window_strides=(1, 1),
            padding=((1, 1), (1, 1)),
            lhs_dilation=(2, 2),
            dimension_numbers=("NCHW", "OIHW", "NCHW"),
        )
        out = jnp.maximum(out, 0.0)
    return out


if __name__ == "__main__":
    key = jax.random.PRNGKey(0)
    k_x, k_w = jax.random.split(key)

    B, Cin, H, W = 2, 4, 16, 16
    channels = [8, 4]

    x = jax.random.normal(k_x, (B, Cin, H, W), dtype=jnp.float32)
    weights = init_upsample_block(k_w, Cin, channels)
    ref = jax.block_until_ready(_ref_forward(x, weights))

    # 1) f32 path: tight check of the fused kernel's algebra / layout.
    packed_f32 = pack_upsample_weights(weights, W, Cin, dtype=jnp.float32)
    out_f32 = jax.block_until_ready(upsample_block_forward(x, packed_f32))
    assert out_f32.shape == (B, channels[-1], H * 4, W * 4), out_f32.shape
    np.testing.assert_allclose(np.asarray(out_f32), np.asarray(ref),
                               rtol=1e-5, atol=1e-5)

    # 2) bf16 production path (half the HBM traffic; f32 MXU accumulation).
    #    Compare against a reference fed the same bf16-rounded inputs/weights.
    packed_bf16 = pack_upsample_weights(weights, W, Cin, dtype=jnp.bfloat16)
    out_bf16 = jax.block_until_ready(upsample_block_forward(x, packed_bf16))
    assert out_bf16.dtype == jnp.bfloat16 and out_bf16.shape == out_f32.shape
    x_q = x.astype(jnp.bfloat16).astype(jnp.float32)
    w_q = [w.astype(jnp.bfloat16).astype(jnp.float32) for w in weights]
    ref_q = jax.block_until_ready(_ref_forward(x_q, w_q))
    np.testing.assert_allclose(np.asarray(out_bf16, dtype=np.float32),
                               np.asarray(ref_q), rtol=3e-2, atol=3e-2)

    print("KERNEL_OK")
</pallas_src>

<mosaic_0001>
module attributes {stable_mosaic.version = 11 : i64} {
  func.func @kernel(%arg0: i32, %arg1: memref<1x8x8xf32, #tpu.memory_space<vmem>>, %arg2: memref<8x32xf32, #tpu.memory_space<vmem>>, %arg3: memref<8x32xf32, #tpu.memory_space<vmem>>, %arg4: memref<32x32xf32, #tpu.memory_space<vmem>>, %arg5: memref<32x32xf32, #tpu.memory_space<vmem>>, %arg6: memref<1x4x8x32xf32, #tpu.memory_space<vmem>>) attributes {dimension_semantics = [#tpu.dimension_semantics<parallel>], iteration_bounds = array<i64: 32>, scalar_prefetch = 0 : i64, scratch_operands = 0 : i64, tpu.core_type = #tpu.core_type<tc>, window_params = [{transform_indices = @transform_0, window_bounds = array<i64: 1, 8, 8>}, {pipeline_mode = #tpu.pipeline_mode<synchronous>, transform_indices = @transform_1, window_bounds = array<i64: 8, 32>}, {pipeline_mode = #tpu.pipeline_mode<synchronous>, transform_indices = @transform_2, window_bounds = array<i64: 8, 32>}, {pipeline_mode = #tpu.pipeline_mode<synchronous>, transform_indices = @transform_3, window_bounds = array<i64: 32, 32>}, {pipeline_mode = #tpu.pipeline_mode<synchronous>, transform_indices = @transform_4, window_bounds = array<i64: 32, 32>}, {transform_indices = @transform_5, window_bounds = array<i64: 1, 4, 8, 32>}]} {
    %c0 = arith.constant 0 : index
    %c0_0 = arith.constant 0 : index
    %c0_1 = arith.constant 0 : index
    %0 = vector.load %arg1[%c0, %c0_0, %c0_1] : memref<1x8x8xf32, #tpu.memory_space<vmem>>, vector<1x8x8xf32>
    %1 = vector.shape_cast %0 : vector<1x8x8xf32> to vector<8x8xf32>
    %c0_2 = arith.constant 0 : index
    %c0_3 = arith.constant 0 : index
    %2 = vector.load %arg2[%c0_2, %c0_3] : memref<8x32xf32, #tpu.memory_space<vmem>>, vector<8x32xf32>
    %c0_4 = arith.constant 0 : index
    %c0_5 = arith.constant 0 : index
    %3 = vector.load %arg3[%c0_4, %c0_5] : memref<8x32xf32, #tpu.memory_space<vmem>>, vector<8x32xf32>
    %cst = arith.constant dense<0.000000e+00> : vector<8x32xf32>
    %4 = tpu.matmul %1, %2, %cst {dimension_numbers = #tpu.dot_dimension_numbers<[1], [0], [0], [1], [0, 0, 1, 1], [], []>} : vector<8x8xf32>, vector<8x32xf32>, vector<8x32xf32> -> vector<8x32xf32>
    %cst_6 = arith.constant dense<0.000000e+00> : vector<8x32xf32>
    %5 = tpu.matmul %1, %3, %cst_6 {dimension_numbers = #tpu.dot_dimension_numbers<[1], [0], [0], [1], [0, 0, 1, 1], [], []>} : vector<8x8xf32>, vector<8x32xf32>, vector<8x32xf32> -> vector<8x32xf32>
    %cst_7 = arith.constant 0.000000e+00 : f32
    %6 = vector.broadcast %cst_7 : f32 to vector<8x32xf32>
    %7 = arith.maximumf %4, %6 : vector<8x32xf32>
    %cst_8 = arith.constant 0.000000e+00 : f32
    %8 = vector.broadcast %cst_8 : f32 to vector<8x32xf32>
    %9 = arith.maximumf %5, %8 : vector<8x32xf32>
    %c0_9 = arith.constant 0 : index
    %c0_10 = arith.constant 0 : index
    %10 = vector.load %arg4[%c0_9, %c0_10] : memref<32x32xf32, #tpu.memory_space<vmem>>, vector<32x32xf32>
    %c0_11 = arith.constant 0 : index
    %c0_12 = arith.constant 0 : index
    %11 = vector.load %arg5[%c0_11, %c0_12] : memref<32x32xf32, #tpu.memory_space<vmem>>, vector<32x32xf32>
    %cst_13 = arith.constant dense<0.000000e+00> : vector<8x32xf32>
    %12 = tpu.matmul %7, %10, %cst_13 {dimension_numbers = #tpu.dot_dimension_numbers<[1], [0], [0], [1], [0, 0, 1, 1], [], []>} : vector<8x32xf32>, vector<32x32xf32>, vector<8x32xf32> -> vector<8x32xf32>
    %cst_14 = arith.constant dense<0.000000e+00> : vector<8x32xf32>
    %13 = tpu.matmul %7, %11, %cst_14 {dimension_numbers = #tpu.dot_dimension_numbers<[1], [0], [0], [1], [0, 0, 1, 1], [], []>} : vector<8x32xf32>, vector<32x32xf32>, vector<8x32xf32> -> vector<8x32xf32>
    %cst_15 = arith.constant 0.000000e+00 : f32
    %14 = vector.broadcast %cst_15 : f32 to vector<8x32xf32>
    %15 = arith.maximumf %12, %14 : vector<8x32xf32>
    %cst_16 = arith.constant 0.000000e+00 : f32
    %16 = vector.broadcast %cst_16 : f32 to vector<8x32xf32>
    %17 = arith.maximumf %13, %16 : vector<8x32xf32>
    %cst_17 = arith.constant dense<0.000000e+00> : vector<8x32xf32>
    %18 = tpu.matmul %9, %10, %cst_17 {dimension_numbers = #tpu.dot_dimension_numbers<[1], [0], [0], [1], [0, 0, 1, 1], [], []>} : vector<8x32xf32>, vector<32x32xf32>, vector<8x32xf32> -> vector<8x32xf32>
    %cst_18 = arith.constant dense<0.000000e+00> : vector<8x32xf32>
    %19 = tpu.matmul %9, %11, %cst_18 {dimension_numbers = #tpu.dot_dimension_numbers<[1], [0], [0], [1], [0, 0, 1, 1], [], []>} : vector<8x32xf32>, vector<32x32xf32>, vector<8x32xf32> -> vector<8x32xf32>
    %cst_19 = arith.constant 0.000000e+00 : f32
    %20 = vector.broadcast %cst_19 : f32 to vector<8x32xf32>
    %21 = arith.maximumf %18, %20 : vector<8x32xf32>
    %cst_20 = arith.constant 0.000000e+00 : f32
    %22 = vector.broadcast %cst_20 : f32 to vector<8x32xf32>
    %23 = arith.maximumf %19, %22 : vector<8x32xf32>
    %c0_21 = arith.constant 0 : index
    %c0_22 = arith.constant 0 : index
    %c0_23 = arith.constant 0 : index
    %c0_24 = arith.constant 0 : index
    %24 = vector.load %arg6[%c0_21, %c0_22, %c0_23, %c0_24] : memref<1x4x8x32xf32, #tpu.memory_space<vmem>>, vector<1x1x8x32xf32>
    %25 = vector.shape_cast %24 : vector<1x1x8x32xf32> to vector<8x32xf32>
    %26 = vector.shape_cast %15 : vector<8x32xf32> to vector<1x1x8x32xf32>
    tpu.vector_store %arg6[%c0_21, %c0_22, %c0_23, %c0_24], %26 {strides = array<i32>} : memref<1x4x8x32xf32, #tpu.memory_space<vmem>>, vector<1x1x8x32xf32>,
    %c0_25 = arith.constant 0 : index
    %c1 = arith.constant 1 : index
    %c0_26 = arith.constant 0 : index
    %c0_27 = arith.constant 0 : index
    %27 = vector.load %arg6[%c0_25, %c1, %c0_26, %c0_27] : memref<1x4x8x32xf32, #tpu.memory_space<vmem>>, vector<1x1x8x32xf32>
    %28 = vector.shape_cast %27 : vector<1x1x8x32xf32> to vector<8x32xf32>
    %29 = vector.shape_cast %17 : vector<8x32xf32> to vector<1x1x8x32xf32>
    tpu.vector_store %arg6[%c0_25, %c1, %c0_26, %c0_27], %29 {strides = array<i32>} : memref<1x4x8x32xf32, #tpu.memory_space<vmem>>, vector<1x1x8x32xf32>,
    %c0_28 = arith.constant 0 : index
    %c2 = arith.constant 2 : index
    %c0_29 = arith.constant 0 : index
    %c0_30 = arith.constant 0 : index
    %30 = vector.load %arg6[%c0_28, %c2, %c0_29, %c0_30] : memref<1x4x8x32xf32, #tpu.memory_space<vmem>>, vector<1x1x8x32xf32>
    %31 = vector.shape_cast %30 : vector<1x1x8x32xf32> to vector<8x32xf32>
    %32 = vector.shape_cast %21 : vector<8x32xf32> to vector<1x1x8x32xf32>
    tpu.vector_store %arg6[%c0_28, %c2, %c0_29, %c0_30], %32 {strides = array<i32>} : memref<1x4x8x32xf32, #tpu.memory_space<vmem>>, vector<1x1x8x32xf32>,
    %c0_31 = arith.constant 0 : index
    %c3 = arith.constant 3 : index
    %c0_32 = arith.constant 0 : index
    %c0_33 = arith.constant 0 : index
    %33 = vector.load %arg6[%c0_31, %c3, %c0_32, %c0_33] : memref<1x4x8x32xf32, #tpu.memory_space<vmem>>, vector<1x1x8x32xf32>
    %34 = vector.shape_cast %33 : vector<1x1x8x32xf32> to vector<8x32xf32>
    %35 = vector.shape_cast %23 : vector<8x32xf32> to vector<1x1x8x32xf32>
    tpu.vector_store %arg6[%c0_31, %c3, %c0_32, %c0_33], %35 {strides = array<i32>} : memref<1x4x8x32xf32, #tpu.memory_space<vmem>>, vector<1x1x8x32xf32>,
    return
  }
  func.func @transform_0(%arg0: i32) -> (i32, i32, i32) {
    %c0_i32 = arith.constant 0 : i32
    %c0_i32_0 = arith.constant 0 : i32
    %c0_i32_1 = arith.constant 0 : i32
    return %arg0, %c0_i32, %c0_i32_0 : i32, i32, i32
  }
  func.func @transform_1(%arg0: i32) -> (i32, i32) {
    %c0_i32 = arith.constant 0 : i32
    %c0_i32_0 = arith.constant 0 : i32
    %c0_i32_1 = arith.constant 0 : i32
    return %c0_i32, %c0_i32_0 : i32, i32
  }
  func.func @transform_2(%arg0: i32) -> (i32, i32) {
    %c0_i32 = arith.constant 0 : i32
    %c0_i32_0 = arith.constant 0 : i32
    %c0_i32_1 = arith.constant 0 : i32
    return %c0_i32, %c0_i32_0 : i32, i32
  }
  func.func @transform_3(%arg0: i32) -> (i32, i32) {
    %c0_i32 = arith.constant 0 : i32
    %c0_i32_0 = arith.constant 0 : i32
    %c0_i32_1 = arith.constant 0 : i32
    return %c0_i32, %c0_i32_0 : i32, i32
  }
  func.func @transform_4(%arg0: i32) -> (i32, i32) {
    %c0_i32 = arith.constant 0 : i32
    %c0_i32_0 = arith.constant 0 : i32
    %c0_i32_1 = arith.constant 0 : i32
    return %c0_i32, %c0_i32_0 : i32, i32
  }
  func.func @transform_5(%arg0: i32) -> (i32, i32, i32, i32) {
    %c0_i32 = arith.constant 0 : i32
    %c0_i32_0 = arith.constant 0 : i32
    %c0_i32_1 = arith.constant 0 : i32
    %c0_i32_2 = arith.constant 0 : i32
    return %arg0, %c0_i32, %c0_i32_0, %c0_i32_1 : i32, i32, i32, i32
  }
}

</mosaic_0001>

<bundles_post_ra>
// kernel: upsample_block_forward.1
= control target key start
LH: loop header
LB: loop body
LE: loop exit
PB: predicated region body
PF: predicated region fallthrough
CT: control target
= control target key end

     0   :  { %10 = vsyncpa [#allocation3], 0  ;;  %s1351_s0 = inlined_call_operand.vmem [shape: f32[32,8,8], index: 0, kind: input, shape index: {}]   ;;  %s1352_s1 = inlined_call_operand.hbm [shape: f32[8,32], index: 1, kind: input, shape index: {}]   ;;  %s1353_s2 = inlined_call_operand.hbm [shape: f32[8,32], index: 2, kind: input, shape index: {}]   ;;  %s1354_s3 = inlined_call_operand.hbm [shape: f32[32,32], index: 3, kind: input, shape index: {}]   ;;  %s1355_s4 = inlined_call_operand.hbm [shape: f32[32,32], index: 4, kind: input, shape index: {}]   ;;  %s1356_s5 = inlined_call_operand.vmem [shape: f32[32,4,8,32], index: 5, kind: output, shape index: {}]  }
   0x1   :  { %11 = vsyncpa [#allocation5], 0 }
   0x2   :  { %12 = vsyncpa [#allocation8], 0  ;;  %s1183_s18 = smov 0  }
   0x3 LB: > { %s1144_s19 = smov [#allocation4]   ;;  %s1189_s21 = sadd.s32 4294967295, %s1142_s18   ;;  %s1142_s18 = sphi %s1183_s18, %s18_s18  }
   0x4   : > { %s183_s20 = sshll.u32 %s1144_s19, 4  ;;  %p830_p0 = scmp.ge.s32.totalorder %s1142_s18, 1  ;;  %s1194_s20 = int_to_ptr.vmem [resolvable:$true] %s183_s20 }
   0x5   : > { %p159_p1 = scmp.lt.s32.totalorder %s1142_s18, 33  ;;  %p1357_p2 = scmp.eq.s32.totalorder %s1189_s21, 0 }
   0x6   : > { %s1145_s23 = smov [#allocation2]   ;;  %s1146_s25 = smov [#allocation6]  }
   0x7   : > { %p1196_p3 = pnand %p830_p0, %p159_p1  ;;  %s172_s24 = sshll.u32 %s1145_s23, 4  ;;  %s1202_s24 = int_to_ptr.vmem [resolvable:$true] %s172_s24 }
   0x8   : > { %s193_s26 = sshll.u32 %s1146_s25, 4  ;;  %s1147_s28 = smov [#allocation7]   ;;  %s1210_s26 = int_to_ptr.vmem [resolvable:$true] %s193_s26 }
   0x9   : > { %s1359_s22 = scalar_select %p1196_p3, 1, 0 }
   0xa   : > { %p974_p4 = pneg %p1196_p3  ;;  %s1212_s29 = sshll.u32 %s1147_s28, 4  ;;  %s207_s29 = int_to_ptr.vmem [resolvable:$true] %s1212_s29 }
   0xb   : > { %s1012_s7 = scalar_lea.hbm %s1353_s2, 128 }
   0xc   : > { %p1206_p5 = pnand %p1357_p2, %p974_p4  ;;  %p1013_p6 = scmp.ne.s32.totalorder %s1353_s2, %s1012_s7 }
   0xd   : > { %p1019_p10 = scmp.lt.u32.totalorder %s1012_s7, %s1353_s2 }
   0xe   : > { %p1222_p7 = pneg %p1206_p5 }
  0x10   : > { %p1015_p8 = pnand %p1222_p7, %p1013_p6 }
  0x12   : > { %p1016_p9 = pneg %p1015_p8 }
  0x14   : > { %p1021_p11 = pnand %p1019_p10, %p1016_p9 }
  0x16   : > { %1024 = shalt.err (!%p1021_p11)
}
  0x17   : > { %s1025_s13 = scalar_lea.vmem %s1194_s20, 128  ;;  %p1033_p1 = scmp.lt.s32.totalorder %s1194_s20, %s1194_s20 }
  0x18   : > { %p1026_p12 = scmp.ne.s32.totalorder %s1194_s20, %s1025_s13  ;;  %p1034_p4 = scmp.lt.s32.totalorder %s1025_s13, %s1025_s13 }
  0x1a   : > { %p1028_p13 = pnand %p1026_p12, %p1222_p7  ;;  %p1035_p6 = por %p1034_p4, %p1033_p1 }
  0x1c   : > { %p1029_p0 = pneg %p1028_p13 }
  0x1e   : > { %p1036_p8 = pnand %p1035_p6, %p1029_p0 }
  0x20   : > { %1039 = shalt.err (!%p1036_p8)
}
  0x21   : > { %980 = dma.hbm_to_vmem [thread:$0]  (!%p1206_p5), %s1353_s2, 128, %s1194_s20, [#allocation5]  }
  0x22   : > { %s1040_s19 = scalar_lea.hbm %s1352_s1, 128 }
  0x23   : > { %p1041_p9 = scmp.ne.s32.totalorder %s1352_s1, %s1040_s19  ;;  %p1047_p12 = scmp.lt.u32.totalorder %s1040_s19, %s1352_s1 }
  0x25   : > { %p1043_p10 = pnand %p1041_p9, %p1222_p7 }
  0x27   : > { %p1044_p11 = pneg %p1043_p10 }
  0x29   : > { %p1049_p13 = pnand %p1047_p12, %p1044_p11 }
  0x2b   : > { %1052 = shalt.err (!%p1049_p13)
}
  0x2c   : > { %s1053_s20 = scalar_lea.vmem %s1202_s24, 128  ;;  %p1061_p6 = scmp.lt.s32.totalorder %s1202_s24, %s1202_s24 }
  0x2d   : > { %p1054_p0 = scmp.ne.s32.totalorder %s1202_s24, %s1053_s20  ;;  %p1062_p8 = scmp.lt.s32.totalorder %s1053_s20, %s1053_s20 }
  0x2f   : > { %p1056_p1 = pnand %p1054_p0, %p1222_p7  ;;  %p1063_p9 = por %p1062_p8, %p1061_p6 }
  0x31   : > { %p1057_p4 = pneg %p1056_p1 }
  0x33   : > { %p1064_p10 = pnand %p1063_p9, %p1057_p4 }
  0x35   : > { %1067 = shalt.err (!%p1064_p10)
}
  0x36   : > { %977 = dma.hbm_to_vmem [thread:$0]  (!%p1206_p5), %s1352_s1, 128, %s1202_s24, [#allocation3]  }
  0x37   : > { %s1068_s11 = scalar_lea.hbm %s1354_s3, 512 }
  0x38   : > { %p1069_p11 = scmp.ne.s32.totalorder %s1354_s3, %s1068_s11  ;;  %p1075_p0 = scmp.lt.u32.totalorder %s1068_s11, %s1354_s3 }
  0x3a   : > { %p1071_p12 = pnand %p1069_p11, %p1222_p7 }
  0x3c   : > { %p1072_p13 = pneg %p1071_p12 }
  0x3e   : > { %p1077_p1 = pnand %p1075_p0, %p1072_p13 }
  0x40   : > { %1080 = shalt.err (!%p1077_p1)
}
  0x41   : > { %s1081_s24 = scalar_lea.vmem %s1210_s26, 512  ;;  %p1089_p9 = scmp.lt.s32.totalorder %s1210_s26, %s1210_s26 }
  0x42   : > { %p1082_p4 = scmp.ne.s32.totalorder %s1210_s26, %s1081_s24  ;;  %p1090_p10 = scmp.lt.s32.totalorder %s1081_s24, %s1081_s24 }
  0x44   : > { %p1084_p6 = pnand %p1082_p4, %p1222_p7  ;;  %p1091_p11 = por %p1090_p10, %p1089_p9 }
  0x46   : > { %p1085_p8 = pneg %p1084_p6 }
  0x48   : > { %p1092_p12 = pnand %p1091_p11, %p1085_p8 }
  0x4a   : > { %1095 = shalt.err (!%p1092_p12)
}
  0x4b   : > { %s1148_s16 = smov 128   ;;  %s1149_s17 = smov 8  }
  0x4c   : > { %983 = dma.hbm_to_vmem [thread:$0]  (!%p1206_p5), %s1354_s3, 512, %s1210_s26, [#allocation5], %s1148_s16, %s1148_s16, %s1149_s17  }
  0x4d   : > { %s1096_s30 = scalar_lea.hbm %s1355_s4, 512 }
  0x4e   : > { %p1097_p13 = scmp.ne.s32.totalorder %s1355_s4, %s1096_s30  ;;  %p1103_p4 = scmp.lt.u32.totalorder %s1096_s30, %s1355_s4 }
  0x50   : > { %p1099_p0 = pnand %p1097_p13, %p1222_p7 }
  0x52   : > { %p1100_p1 = pneg %p1099_p0 }
  0x54   : > { %p1105_p6 = pnand %p1103_p4, %p1100_p1 }
  0x56   : > { %1108 = shalt.err (!%p1105_p6)
}
  0x57   : > { %s1109_s9 = scalar_lea.vmem %s207_s29, 512  ;;  %p1117_p11 = scmp.lt.s32.totalorder %s207_s29, %s207_s29 }
  0x58   : > { %p1110_p8 = scmp.ne.s32.totalorder %s207_s29, %s1109_s9  ;;  %p1118_p12 = scmp.lt.s32.totalorder %s1109_s9, %s1109_s9 }
  0x5a   : > { %p1112_p9 = pnand %p1110_p8, %p1222_p7  ;;  %p1119_p2 = por %p1118_p12, %p1117_p11 }
  0x5c   : > { %p1113_p10 = pneg %p1112_p9 }
  0x5e   : > { %p1120_p3 = pnand %p1119_p2, %p1113_p10 }
  0x60   : > { %1123 = shalt.err (!%p1120_p3)
}
  0x61   : > { %986 = dma.hbm_to_vmem [thread:$0]  (!%p1206_p5), %s1355_s4, 512, %s207_s29, [#allocation8], %s1148_s16, %s1148_s16, %s1149_s17  }
  0x62   : > { %p1362_p13 = scmp.ne.s32.totalorder %s1359_s22, 0 }
  0x63   : > { %p1363_p0 = scmp.eq.s32.totalorder (!%p1362_p13), %s1189_s21, 0 }
  0x64   : > { %229 = sbr.rel (%p1362_p13) target bundleno = 557 (0x22d), region = 40 }
  0x6b   : > { %1129 = dma.done.wait (%p1363_p0), [#allocation3], 128   ;;  %p1364_p7 = pmov %p1363_p0 }
  0x6c   : > { %p1365_p1 = pmov %p1363_p0 }
  0x6d   : > { %1131 = vsyncadd (%p1364_p7), [#allocation3], 4294967168 }
  0x6e   : > { %1133 = dma.done.wait (%p1365_p1), [#allocation5], 640   ;;  %p1366_p2 = pmov %p1363_p0 }
  0x6f   : > { %p1367_p3 = pmov %p1363_p0 }
  0x70   : > { %1135 = vsyncadd (%p1366_p2), [#allocation5], 4294966656 }
  0x71   : > { %1137 = dma.done.wait (%p1367_p3), [#allocation8], 512   ;;  %p1368_p5 = pmov %p1363_p0 }
  0x72   : > { %p268_p4 = scmp.lt.s32.totalorder %s1189_s21, 31  ;;  %v1150_v0 = vmov 0.0   ;;  %vm1151_vm0 = vmmov 0   ;;  %vm280_vm1 = vcmask 64512   ;;  %v278_v1 = vld [vmem:[#allocation2] sm:$0xff]  ;;  %v279_v3 = vld [vmem:[#allocation4] sm:$0xff] }
  0x73   : > { %1139 = vsyncadd (%p1368_p5), [#allocation8], 4294966784  ;;  %880 = vmatprep.subr.mxu0 %v1150_v0  ;;  %882 = vmatprep.mubr.msk.f32.mxu0 %vm1151_vm0, %v1150_v0  ;;  %v426_v4 = vld [vmem:[#allocation6] sm:$0xff]  ;;  %v427_v5 = vld [vmem:[#allocation6 + $0x8] sm:$0xff]  ;;  %v1152_v11 = vmov 0.0|0.0   ;;  %vm434_vm2 = vcmask 261120  }
  0x74   : > { %s1370_s21 = smov (!%p268_p4, %s1189_s21), 31  ;;  %885 = vmatprep.subr.mxu1 %v1150_v0  ;;  %887 = vmatprep.mubr.msk.f32.mxu1 %vm1151_vm0, %v1150_v0  ;;  %v430_v6 = vld [vmem:[#allocation7] sm:$0xff]  ;;  %v935_v7 = vpack.c.bf16 %v427_v5, %v426_v4  ;;  %v431_v8 = vld [vmem:[#allocation7 + $0x8] sm:$0xff]  ;;  %v428_v9 = vld [vmem:[#allocation6 + $0x10] sm:$0xff] }
  0x75   : > { %s841_s22 = sshll.u32 %s1370_s21, 3  ;;  %881 = vmatpush3.msra.mxu0 %v278_v1  ;;  %886 = vmatpush3.msra.mxu1 %v279_v3  ;;  %v429_v10 = vld [vmem:[#allocation6 + $0x18] sm:$0xff]  ;;  %v941_v12 = vpack.c.bf16 %v431_v8, %v430_v6  ;;  %v432_v13 = vld [vmem:[#allocation7 + $0x10] sm:$0xff]  ;;  %s855_s12 = sshll.u32 %s1370_s21, 5 }
  0x76   : > { %s271_s10 = scalar_lea.vmem %s1351_s0, %s841_s22  ;;  %934 = vmatprep.subr.bf16.mxu0 %v1152_v11  ;;  %940 = vmatprep.subr.bf16.mxu1 %v1152_v11  ;;  %v433_v14 = vld [vmem:[#allocation7 + $0x18] sm:$0xff]  ;;  %v938_v15 = vpack.c.bf16 %v429_v10, %v428_v9  ;;  %s276_s15 = scalar_lea.vmem %s1356_s5, %s855_s12 }
  0x77   : > { %v277_v2 = vld [vmem:[%s271_s10] sm:$0xff]  ;;  %v944_v16 = vpack.c.bf16 %v433_v14, %v432_v13 }
  0x78   : > { %883 = vmatmul.mubr.msk.f32.vlgmr.msra.gmra.mrb[0].mxu0 %vm280_vm1, %v277_v2  ;;  %888 = vmatmul.mubr.msk.f32.vlgmr.msra.gmra.mrb[0].mxu1 %vm280_vm1, %v277_v2 }
  0x79   : > { %936 = vmatpush3.bf16.msra.mxu0 %v935_v7  ;;  %898 = vmatprep.mubr.msk.f32.mxu0 %vm1151_vm0, %v1150_v0 }
  0x7a   : > { %942 = vmatpush3.bf16.msra.mxu1 %v941_v12  ;;  %937 = vmatprep.subr.bf16.mxu0 %v1152_v11 }
  0x7b   : > { %943 = vmatprep.subr.bf16.mxu1 %v1152_v11  ;;  %909 = vmatprep.mubr.msk.f32.mxu1 %vm1151_vm0, %v1150_v0 }
  0x7d   : > { %939 = vmatpush3.bf16.msra.mxu0 %v938_v15 }
  0x7e   : > { %945 = vmatpush3.bf16.msra.mxu1 %v944_v16  ;;  %946 = vmatprep.subr.bf16.mxu0 %v1152_v11 }
  0x7f   : > { %952 = vmatprep.subr.bf16.mxu1 %v1152_v11 }
 0x14b   : > { %v350_v17 = vpop.f32.mrb[0].mxu0  ;;  %v420_v18 = vpop.f32.mrb[0].mxu1 }
 0x14c   : > { %v424_v19 = vmax.f32 %v350_v17, 0.0  ;;  %v884_v20 = vpop.f32.mrb[1].mxu0  ;;  %v889_v21 = vpop.f32.mrb[1].mxu1  ;;  %v425_v22 = vmax.f32 %v420_v18, 0.0 }
 0x14e   : > { %899 = vmatmul.mubr.msk.f32.vlgmr.msra.gmra.mrb[2].mxu0 %vm434_vm2, %v424_v19  ;;  %910 = vmatmul.mubr.msk.f32.vlgmr.msra.gmra.mrb[2].mxu1 %vm434_vm2, %v424_v19 }
 0x14f   : > { %948 = vmatpush3.bf16.msra.mxu0 %v935_v7  ;;  %954 = vmatpush3.bf16.msra.mxu1 %v941_v12 }
 0x150   : > { %949 = vmatprep.subr.bf16.mxu0 %v1152_v11  ;;  %955 = vmatprep.subr.bf16.mxu1 %v1152_v11 }
 0x151   : > { %920 = vmatprep.mubr.msk.f32.mxu0 %vm1151_vm0, %v1150_v0  ;;  %931 = vmatprep.mubr.msk.f32.mxu1 %vm1151_vm0, %v1150_v0 }
 0x153   : > { %951 = vmatpush3.bf16.msra.mxu0 %v938_v15  ;;  %957 = vmatpush3.bf16.msra.mxu1 %v944_v16 }
 0x156   : > { %921 = vmatmul.mubr.msk.f32.vlgmr.msra.gmra.mrb[4].mxu0 %vm434_vm2, %v425_v22  ;;  %932 = vmatmul.mubr.msk.f32.vlgmr.msra.gmra.mrb[4].mxu1 %vm434_vm2, %v425_v22 }
 0x221   : > { %v504_v23 = vpop.f32.mrb[2].mxu0  ;;  %v574_v24 = vpop.f32.mrb[2].mxu1 }
 0x222   : > { %v578_v25 = vmax.f32 %v504_v23, 0.0  ;;  %v579_v26 = vmax.f32 %v574_v24, 0.0  ;;  %v900_v27 = vpop.f32.mrb[3].mxu0  ;;  %v911_v28 = vpop.f32.mrb[3].mxu1 }
 0x224   : > { %725 = vst.msk [vmem:[%s276_s15] sm:$0xff] %vm434_vm2, %v578_v25  ;;  %850 = vst.msk [vmem:[%s276_s15 + $0x8] sm:$0xff] %vm434_vm2, %v579_v26 }
 0x229   : > { %v649_v29 = vpop.f32.mrb[4].mxu0  ;;  %v719_v30 = vpop.f32.mrb[4].mxu1 }
 0x22a   : > { %v723_v31 = vmax.f32 %v649_v29, 0.0  ;;  %v724_v32 = vmax.f32 %v719_v30, 0.0  ;;  %v922_v33 = vpop.f32.mrb[5].mxu0  ;;  %v933_v34 = vpop.f32.mrb[5].mxu1 }
 0x22c   : > { %851 = vst.msk [vmem:[%s276_s15 + $0x10] sm:$0xff] %vm434_vm2, %v723_v31  ;;  %852 = vst.msk [vmem:[%s276_s15 + $0x18] sm:$0xff] %vm434_vm2, %v724_v32 }
 0x22d PF: > { %s18_s18 = sadd.s32 1, %s1142_s18  }
 0x22e   : > { %p15_p6 = scmp.ge.s32.totalorder %s18_s18, 34  }
 0x230   :  { %17 = sbr.rel (!%p15_p6) target bundleno = 3 (0x3), region = 90 }
 0x237   :  { %753 = vsyncpa [#allocation3], 1 }
 0x238   :  { %755 = vsyncpa [#allocation3 + $0x1], 1 }
 0x239   :  { %756 = vsyncpa [#allocation5], 1 }
 0x23a   :  { %757 = vsyncpa [#allocation8], 1 }

</bundles_post_ra>
